<compile_context>
chip_gen: v7x
topology: tpu7x:2x2x1
jax: 0.10.0
libtpu: 0.0.40
codegen_flags: <defaults>
</compile_context>

<pallas_src>
import functools

import jax
import jax.numpy as jnp
from jax.experimental import pallas as pl
from jax.experimental.pallas import tpu as pltpu

LANE = 128
SUBLANE_BF16 = 16  # minimum sublane tile for bf16 operands


def _round_up(x, m):
    return ((x + m - 1) // m) * m


def _vmem_cap_bytes():
    """Per-generation VMEM cap (leave headroom below physical / scoped limits)."""
    try:
        phys = pltpu.get_tpu_info().vmem_capacity_bytes
    except Exception:
        phys = 64 * 1024 * 1024  # assume the smallest (v7x-class) if query unavailable
    return int(min(phys * 3 // 4, 100 * 1024 * 1024))


def _choose_tile_n(n_nodes):
    """Node-tile size: multiple of 16, minimal padding, >=2 tiles for larger graphs."""
    n16 = _round_up(max(n_nodes, 1), SUBLANE_BF16)
    if n16 <= 256:
        return n16  # single (or near-single) tile, minimal padding
    best_t, best_key = None, None
    for t in (128, 256, 512):
        np_ = _round_up(n_nodes, t)
        if np_ // t < 2:
            continue  # keep >=2 tiles so v7x's 2nd TensorCore gets work
        key = (np_ - n_nodes, -t)  # minimise padding, prefer bigger tile on ties
        if best_key is None or key < best_key:
            best_key, best_t = key, t
    return best_t


# ----------------------------------------------------------------------------
# Pallas kernel: fused  agg @ W_spline + x @ W_root + bias  followed by ReLU
# ----------------------------------------------------------------------------
def _fused_spline_linear_relu_kernel(agg_ref, x_ref, wsp_ref, wrt_ref, b_ref, o_ref):
    bias = b_ref[...]  # (1, Cp_out) f32, read once
    acc = jnp.dot(agg_ref[...], wsp_ref[...], preferred_element_type=jnp.float32)
    acc = acc + jnp.dot(x_ref[...], wrt_ref[...], preferred_element_type=jnp.float32)
    o_ref[...] = jnp.maximum(acc + bias, 0.0).astype(o_ref.dtype)


def fused_spline_root_bias_relu(agg, x, w_sp, w_rt, b, tile_n, out_dtype):
    """relu(agg @ w_sp + x @ w_rt + b); operands already padded to TPU shapes.

    agg : (Np, Dsp)   bf16, Np % tile_n == 0, Dsp % 128 == 0   (node-tiled, pipelined)
    x   : (Np, Cin_p) bf16, Cin_p % 128 == 0                   (node-tiled, pipelined)
    w_sp: (Dsp, Cout_p) bf16    (resident in VMEM)
    w_rt: (Cin_p, Cout_p) bf16  (resident in VMEM)
    b   : (1, Cout_p) f32
    returns (Np, Cout_p) out_dtype
    """
    Np, Dsp = agg.shape
    Npx, Cin_p = x.shape
    _, Cout_p = w_sp.shape
    assert Np == Npx and Np % tile_n == 0
    assert Dsp % LANE == 0 and Cin_p % LANE == 0 and Cout_p % LANE == 0
    assert tile_n % SUBLANE_BF16 == 0

    out_bytes = 4 if out_dtype == jnp.float32 else 2
    need = (2 * tile_n * (Dsp + Cin_p) * 2          # double-buffered bf16 A operands
            + 2 * tile_n * Cout_p * out_bytes       # double-buffered output tile
            + 2 * (Dsp + Cin_p) * Cout_p * 2        # resident bf16 weights (conservative x2)
            + 2 * Cout_p * 4)                       # bias
    vmem_limit = int(min(max(2 * need, 4 * 1024 * 1024), _vmem_cap_bytes()))

    return pl.pallas_call(
        _fused_spline_linear_relu_kernel,
        out_shape=jax.ShapeDtypeStruct((Np, Cout_p), out_dtype),
        grid=(Np // tile_n,),
        in_specs=[
            pl.BlockSpec((tile_n, Dsp), lambda i: (i, 0)),
            pl.BlockSpec((tile_n, Cin_p), lambda i: (i, 0)),
            pl.BlockSpec((Dsp, Cout_p), lambda i: (0, 0)),    # spline weight resident
            pl.BlockSpec((Cin_p, Cout_p), lambda i: (0, 0)),  # root weight resident
            pl.BlockSpec((1, Cout_p), lambda i: (0, 0)),      # bias resident
        ],
        out_specs=pl.BlockSpec((tile_n, Cout_p), lambda i: (i, 0)),
        compiler_params=pltpu.CompilerParams(
            dimension_semantics=("parallel",),
            vmem_limit_bytes=vmem_limit,
        ),
    )(agg, x, w_sp, w_rt, b)


# ----------------------------------------------------------------------------
# SplineConv pieces (degree-1 open B-spline, pseudo-coordinate dim = 1)
# ----------------------------------------------------------------------------
def spline_basis_deg1_open(u, kernel_size):
    """u: (E,) pseudo-coords in [0, 1] -> ((E, 2) weights, (E, 2) indices)."""
    p = u * (kernel_size - 1)
    fl = jnp.floor(p)
    frac = p - fl
    idx0 = jnp.clip(fl.astype(jnp.int32), 0, kernel_size - 1)
    idx1 = jnp.clip(idx0 + 1, 0, kernel_size - 1)  # weight is 0 whenever clipped (u in [0,1])
    w = jnp.stack([1.0 - frac, frac], axis=-1)
    idx = jnp.stack([idx0, idx1], axis=-1)
    return w, idx


def _mesh_encoder_forward(padded_params, x, edge_index, edge_attr, *,
                          kernel_size, out_channels, channel_dims, tile_n,
                          num_nodes_padded):
    N = x.shape[0]
    Np = num_nodes_padded
    K = kernel_size
    num_layers = len(channel_dims) - 1

    src = edge_index[0]
    dst = edge_index[1]
    E = src.shape[0]
    basis_w, basis_idx = spline_basis_deg1_open(
        edge_attr[:, 0].astype(jnp.float32), K)

    # Fold mean-aggregation (degree) normalisation into the edge-level basis weights.
    # Degree counting stays in f32 (exact integer counts).
    deg = jax.ops.segment_sum(jnp.ones((E,), jnp.float32), dst, num_segments=Np)
    inv_deg = 1.0 / jnp.maximum(deg, 1.0)
    bw = basis_w * inv_deg[dst][:, None]                         # (E, 2) f32
    seg0 = dst * K + basis_idx[:, 0]
    seg1 = dst * K + basis_idx[:, 1]

    # Activations stay PADDED (lane-dense) and bf16 across layers.  Padded node rows
    # never mix into real rows (src/dst < N) and are dropped by the final slice.
    cin0 = channel_dims[0]
    cp0 = _round_up(cin0, LANE)
    x_pad = jnp.zeros((Np, cp0), jnp.bfloat16).at[:N, :cin0].set(
        x.astype(jnp.bfloat16))

    for li in range(num_layers):
        cin = channel_dims[li]
        w_sp, w_rt, b_pad = padded_params[li]
        dsp = w_sp.shape[0]

        # Gather only the real channels (padded lanes carry nothing useful here).
        xn = x_pad[:, :cin][src]                                 # (E, cin) bf16

        # Degree-1 spline: exactly 2 non-zero basis functions per edge -> two scaled
        # segment_sums into a flat (Np*K, cin) f32 accumulator (no (E,K,C) tensor,
        # no post-hoc inv_deg pass).
        agg = jax.ops.segment_sum(bw[:, 0:1] * xn, seg0, num_segments=Np * K)
        agg = agg + jax.ops.segment_sum(bw[:, 1:2] * xn, seg1, num_segments=Np * K)
        agg = agg.reshape(Np, K * cin)
        agg_p = jnp.pad(agg, ((0, 0), (0, dsp - K * cin))).astype(jnp.bfloat16)

        out_dtype = jnp.float32 if li == num_layers - 1 else jnp.bfloat16
        x_pad = fused_spline_root_bias_relu(agg_p, x_pad, w_sp, w_rt, b_pad,
                                            tile_n, out_dtype)

    return x_pad[:N, :out_channels]


class MeshEncoderPallas:
    """Stack of SplineConv layers, each followed by ReLU (matches MeshEncoder.forward)."""

    def __init__(self, in_channels, hidden_channels, out_channels, kernel_size,
                 num_layers, dim, key):
        assert dim == 1, "edge_attr is (E, 1) in the reference forward -> pseudo dim = 1"
        self.kernel_size = kernel_size
        self.out_channels = out_channels
        dims = [in_channels] + [hidden_channels] * (num_layers - 1) + [out_channels]
        self.channel_dims = tuple(dims)

        self.raw_params = []      # f32 unpadded (for reference check)
        self.padded_params = []   # bf16 packed/padded spline + root weights, f32 bias
        for i in range(num_layers):
            key, k1, k2, k3 = jax.random.split(key, 4)
            cin, cout = dims[i], dims[i + 1]
            w = jax.random.uniform(k1, (kernel_size, cin, cout), jnp.float32, -0.1, 0.1)
            wr = jax.random.uniform(k2, (cin, cout), jnp.float32, -0.1, 0.1)
            b = jax.random.uniform(k3, (cout,), jnp.float32, -0.1, 0.1)
            self.raw_params.append((w, wr, b))

            # Pack spline taps along the channel axis BEFORE padding:
            # real rows = K*cin (k*cin + c), padded once to a 128 multiple.
            dsp = _round_up(kernel_size * cin, LANE)
            cin_p = _round_up(cin, LANE)
            cout_p = _round_up(cout, LANE)
            w_sp = jnp.zeros((dsp, cout_p), jnp.float32)
            w_sp = w_sp.at[:kernel_size * cin, :cout].set(
                w.reshape(kernel_size * cin, cout)).astype(jnp.bfloat16)
            w_rt = jnp.zeros((cin_p, cout_p), jnp.float32)
            w_rt = w_rt.at[:cin, :cout].set(wr).astype(jnp.bfloat16)
            b_pad = jnp.zeros((1, cout_p), jnp.float32).at[0, :cout].set(b)
            self.padded_params.append((w_sp, w_rt, b_pad))

        self._jitted = None
        self._jit_key = None

    def __call__(self, x, edge_index, edge_attr):
        N = x.shape[0]
        tile_n = _choose_tile_n(N)
        Np = _round_up(N, tile_n)
        key = (tile_n, Np, x.shape, edge_index.shape, edge_attr.shape)
        if self._jit_key != key:
            self._jitted = jax.jit(functools.partial(
                _mesh_encoder_forward,
                kernel_size=self.kernel_size,
                out_channels=self.out_channels,
                channel_dims=self.channel_dims,
                tile_n=tile_n,
                num_nodes_padded=Np,
            ))
            self._jit_key = key
        return self._jitted(tuple(self.padded_params), x, edge_index, edge_attr)


# ----------------------------------------------------------------------------
# Pure-JAX f32 reference (mirrors the PyTorch module semantics)
# ----------------------------------------------------------------------------
def mesh_encoder_reference(raw_params, x, edge_index, edge_attr, kernel_size):
    N = x.shape[0]
    src, dst = edge_index[0], edge_index[1]
    u = edge_attr[:, 0].astype(jnp.float32)
    basis_w, basis_idx = spline_basis_deg1_open(u, kernel_size)
    out = x.astype(jnp.float32)
    for (w, wr, b) in raw_params:
        xn = out[src]                                                    # (E, Cin)
        onehot = jax.nn.one_hot(basis_idx, kernel_size, dtype=jnp.float32)
        coef = jnp.einsum("es,esk->ek", basis_w, onehot)                 # (E, K)
        contrib = coef[:, :, None] * xn[:, None, :]                      # (E, K, Cin)
        agg = jax.ops.segment_sum(contrib, dst, num_segments=N)
        deg = jax.ops.segment_sum(jnp.ones_like(u), dst, num_segments=N)
        agg = agg / jnp.maximum(deg, 1.0)[:, None, None]
        msg = jnp.einsum("nkc,kcd->nd", agg, w)
        out = jnp.maximum(msg + out @ wr + b, 0.0)
    return out


# ----------------------------------------------------------------------------
# Demo / smoke test
# ----------------------------------------------------------------------------
if __name__ == "__main__":
    key = jax.random.PRNGKey(0)
    k_x, k_src, k_attr, k_params = jax.random.split(key, 4)

    N = 32          # number of mesh vertices
    k_nbrs = 6      # neighbors per vertex -> E = N * k
    in_channels = 3
    hidden_channels = 16
    out_channels = 8
    kernel_size = 4
    num_layers = 3
    dim = 1         # pseudo-coordinate dimension (edge_attr is (E, 1))

    x = jax.random.normal(k_x, (N, in_channels), jnp.float32)
    src = jax.random.randint(k_src, (N * k_nbrs,), 0, N, jnp.int32)
    dst = jnp.repeat(jnp.arange(N, dtype=jnp.int32), k_nbrs)
    edge_index = jnp.stack([src, dst], axis=0)              # (2, N*k)
    edge_attr = jax.random.uniform(k_attr, (N * k_nbrs, 1), jnp.float32)

    encoder = MeshEncoderPallas(in_channels, hidden_channels, out_channels,
                                kernel_size, num_layers, dim, k_params)

    out = jax.block_until_ready(encoder(x, edge_index, edge_attr))
    assert out.shape == (N, out_channels)

    # Correctness check of the fused Pallas path against the pure-JAX f32 reference
    # (bf16 MXU inputs / bf16 inter-layer activations with f32 accumulation).
    ref = jax.block_until_ready(
        mesh_encoder_reference(encoder.raw_params, x, edge_index, edge_attr, kernel_size))
    assert jnp.allclose(out, ref, atol=3e-2, rtol=3e-2), \
        float(jnp.max(jnp.abs(out - ref)))

    print("KERNEL_OK")
</pallas_src>

<mosaic_0001>
module attributes {stable_mosaic.version = 11 : i64} {
  func.func private @main(%arg0: i32) attributes {dimension_semantics = [#tpu.dimension_semantics<core_parallel>], iteration_bounds = array<i64: 2>, tpu.core_type = #tpu.core_type<sc_scalar_subcore>, window_params = []} {
    return
  }
}

module attributes {stable_mosaic.version = 11 : i64} {
  func.func private @main(%arg0: i32) attributes {dimension_semantics = [#tpu.dimension_semantics<core_parallel>], iteration_bounds = array<i64: 2>, tpu.core_type = #tpu.core_type<sc_scalar_subcore>, window_params = []} {
    return
  }
}

module attributes {stable_mosaic.version = 11 : i64} {
  func.func @_fused_spline_linear_relu_kernel(%arg0: i32, %arg1: memref<32x128xbf16, #tpu.memory_space<vmem>>, %arg2: memref<32x128xbf16, #tpu.memory_space<vmem>>, %arg3: memref<128x128xbf16, #tpu.memory_space<vmem>>, %arg4: memref<128x128xbf16, #tpu.memory_space<vmem>>, %arg5: memref<1x128xf32, #tpu.memory_space<vmem>>, %arg6: memref<32x128xbf16, #tpu.memory_space<vmem>>) attributes {dimension_semantics = [#tpu.dimension_semantics<parallel>], iteration_bounds = array<i64: 1>, scalar_prefetch = 0 : i64, scratch_operands = 0 : i64, tpu.core_type = #tpu.core_type<tc>, window_params = [{transform_indices = @transform_0, window_bounds = array<i64: 32, 128>}, {transform_indices = @transform_1, window_bounds = array<i64: 32, 128>}, {pipeline_mode = #tpu.pipeline_mode<synchronous>, transform_indices = @transform_2, window_bounds = array<i64: 128, 128>}, {pipeline_mode = #tpu.pipeline_mode<synchronous>, transform_indices = @transform_3, window_bounds = array<i64: 128, 128>}, {pipeline_mode = #tpu.pipeline_mode<synchronous>, transform_indices = @transform_4, window_bounds = array<i64: 1, 128>}, {transform_indices = @transform_5, window_bounds = array<i64: 32, 128>}]} {
    %c0 = arith.constant 0 : index
    %c0_0 = arith.constant 0 : index
    %0 = vector.load %arg5[%c0, %c0_0] : memref<1x128xf32, #tpu.memory_space<vmem>>, vector<1x128xf32>
    %c0_1 = arith.constant 0 : index
    %c0_2 = arith.constant 0 : index
    %1 = vector.load %arg1[%c0_1, %c0_2] : memref<32x128xbf16, #tpu.memory_space<vmem>>, vector<32x128xbf16>
    %c0_3 = arith.constant 0 : index
    %c0_4 = arith.constant 0 : index
    %2 = vector.load %arg3[%c0_3, %c0_4] : memref<128x128xbf16, #tpu.memory_space<vmem>>, vector<128x128xbf16>
    %cst = arith.constant dense<0.000000e+00> : vector<32x128xf32>
    %3 = tpu.matmul %1, %2, %cst {dimension_numbers = #tpu.dot_dimension_numbers<[1], [0], [0], [1], [0, 0, 1, 1], [], []>} : vector<32x128xbf16>, vector<128x128xbf16>, vector<32x128xf32> -> vector<32x128xf32>
    %c0_5 = arith.constant 0 : index
    %c0_6 = arith.constant 0 : index
    %4 = vector.load %arg2[%c0_5, %c0_6] : memref<32x128xbf16, #tpu.memory_space<vmem>>, vector<32x128xbf16>
    %c0_7 = arith.constant 0 : index
    %c0_8 = arith.constant 0 : index
    %5 = vector.load %arg4[%c0_7, %c0_8] : memref<128x128xbf16, #tpu.memory_space<vmem>>, vector<128x128xbf16>
    %cst_9 = arith.constant dense<0.000000e+00> : vector<32x128xf32>
    %6 = tpu.matmul %4, %5, %cst_9 {dimension_numbers = #tpu.dot_dimension_numbers<[1], [0], [0], [1], [0, 0, 1, 1], [], []>} : vector<32x128xbf16>, vector<128x128xbf16>, vector<32x128xf32> -> vector<32x128xf32>
    %7 = arith.addf %3, %6 : vector<32x128xf32>
    %8 = vector.broadcast %0 : vector<1x128xf32> to vector<32x128xf32>
    %9 = arith.addf %7, %8 : vector<32x128xf32>
    %cst_10 = arith.constant 0.000000e+00 : f32
    %10 = vector.broadcast %cst_10 : f32 to vector<32x128xf32>
    %11 = arith.maximumf %9, %10 : vector<32x128xf32>
    %12 = arith.truncf %11 : vector<32x128xf32> to vector<32x128xbf16>
    %c0_11 = arith.constant 0 : index
    %c0_12 = arith.constant 0 : index
    %13 = vector.load %arg6[%c0_11, %c0_12] : memref<32x128xbf16, #tpu.memory_space<vmem>>, vector<32x128xbf16>
    tpu.vector_store %arg6[%c0_11, %c0_12], %12 {strides = array<i32>} : memref<32x128xbf16, #tpu.memory_space<vmem>>, vector<32x128xbf16>,
    return
  }
  func.func @transform_0(%arg0: i32) -> (i32, i32) {
    %c0_i32 = arith.constant 0 : i32
    %c0_i32_0 = arith.constant 0 : i32
    return %arg0, %c0_i32 : i32, i32
  }
  func.func @transform_1(%arg0: i32) -> (i32, i32) {
    %c0_i32 = arith.constant 0 : i32
    %c0_i32_0 = arith.constant 0 : i32
    return %arg0, %c0_i32 : i32, i32
  }
  func.func @transform_2(%arg0: i32) -> (i32, i32) {
    %c0_i32 = arith.constant 0 : i32
    %c0_i32_0 = arith.constant 0 : i32
    %c0_i32_1 = arith.constant 0 : i32
    return %c0_i32, %c0_i32_0 : i32, i32
  }
  func.func @transform_3(%arg0: i32) -> (i32, i32) {
    %c0_i32 = arith.constant 0 : i32
    %c0_i32_0 = arith.constant 0 : i32
    %c0_i32_1 = arith.constant 0 : i32
    return %c0_i32, %c0_i32_0 : i32, i32
  }
  func.func @transform_4(%arg0: i32) -> (i32, i32) {
    %c0_i32 = arith.constant 0 : i32
    %c0_i32_0 = arith.constant 0 : i32
    %c0_i32_1 = arith.constant 0 : i32
    return %c0_i32, %c0_i32_0 : i32, i32
  }
  func.func @transform_5(%arg0: i32) -> (i32, i32) {
    %c0_i32 = arith.constant 0 : i32
    %c0_i32_0 = arith.constant 0 : i32
    return %arg0, %c0_i32 : i32, i32
  }
}

module attributes {stable_mosaic.version = 11 : i64} {
  func.func @_fused_spline_linear_relu_kernel(%arg0: i32, %arg1: memref<32x128xbf16, #tpu.memory_space<vmem>>, %arg2: memref<32x128xbf16, #tpu.memory_space<vmem>>, %arg3: memref<128x128xbf16, #tpu.memory_space<vmem>>, %arg4: memref<128x128xbf16, #tpu.memory_space<vmem>>, %arg5: memref<1x128xf32, #tpu.memory_space<vmem>>, %arg6: memref<32x128xf32, #tpu.memory_space<vmem>>) attributes {dimension_semantics = [#tpu.dimension_semantics<parallel>], iteration_bounds = array<i64: 1>, scalar_prefetch = 0 : i64, scratch_operands = 0 : i64, tpu.core_type = #tpu.core_type<tc>, window_params = [{transform_indices = @transform_0, window_bounds = array<i64: 32, 128>}, {transform_indices = @transform_1, window_bounds = array<i64: 32, 128>}, {pipeline_mode = #tpu.pipeline_mode<synchronous>, transform_indices = @transform_2, window_bounds = array<i64: 128, 128>}, {pipeline_mode = #tpu.pipeline_mode<synchronous>, transform_indices = @transform_3, window_bounds = array<i64: 128, 128>}, {pipeline_mode = #tpu.pipeline_mode<synchronous>, transform_indices = @transform_4, window_bounds = array<i64: 1, 128>}, {transform_indices = @transform_5, window_bounds = array<i64: 32, 128>}]} {
    %c0 = arith.constant 0 : index
    %c0_0 = arith.constant 0 : index
    %0 = vector.load %arg5[%c0, %c0_0] : memref<1x128xf32, #tpu.memory_space<vmem>>, vector<1x128xf32>
    %c0_1 = arith.constant 0 : index
    %c0_2 = arith.constant 0 : index
    %1 = vector.load %arg1[%c0_1, %c0_2] : memref<32x128xbf16, #tpu.memory_space<vmem>>, vector<32x128xbf16>
    %c0_3 = arith.constant 0 : index
    %c0_4 = arith.constant 0 : index
    %2 = vector.load %arg3[%c0_3, %c0_4] : memref<128x128xbf16, #tpu.memory_space<vmem>>, vector<128x128xbf16>
    %cst = arith.constant dense<0.000000e+00> : vector<32x128xf32>
    %3 = tpu.matmul %1, %2, %cst {dimension_numbers = #tpu.dot_dimension_numbers<[1], [0], [0], [1], [0, 0, 1, 1], [], []>} : vector<32x128xbf16>, vector<128x128xbf16>, vector<32x128xf32> -> vector<32x128xf32>
    %c0_5 = arith.constant 0 : index
    %c0_6 = arith.constant 0 : index
    %4 = vector.load %arg2[%c0_5, %c0_6] : memref<32x128xbf16, #tpu.memory_space<vmem>>, vector<32x128xbf16>
    %c0_7 = arith.constant 0 : index
    %c0_8 = arith.constant 0 : index
    %5 = vector.load %arg4[%c0_7, %c0_8] : memref<128x128xbf16, #tpu.memory_space<vmem>>, vector<128x128xbf16>
    %cst_9 = arith.constant dense<0.000000e+00> : vector<32x128xf32>
    %6 = tpu.matmul %4, %5, %cst_9 {dimension_numbers = #tpu.dot_dimension_numbers<[1], [0], [0], [1], [0, 0, 1, 1], [], []>} : vector<32x128xbf16>, vector<128x128xbf16>, vector<32x128xf32> -> vector<32x128xf32>
    %7 = arith.addf %3, %6 : vector<32x128xf32>
    %8 = vector.broadcast %0 : vector<1x128xf32> to vector<32x128xf32>
    %9 = arith.addf %7, %8 : vector<32x128xf32>
    %cst_10 = arith.constant 0.000000e+00 : f32
    %10 = vector.broadcast %cst_10 : f32 to vector<32x128xf32>
    %11 = arith.maximumf %9, %10 : vector<32x128xf32>
    %c0_11 = arith.constant 0 : index
    %c0_12 = arith.constant 0 : index
    %12 = vector.load %arg6[%c0_11, %c0_12] : memref<32x128xf32, #tpu.memory_space<vmem>>, vector<32x128xf32>
    tpu.vector_store %arg6[%c0_11, %c0_12], %11 {strides = array<i32>} : memref<32x128xf32, #tpu.memory_space<vmem>>, vector<32x128xf32>,
    return
  }
  func.func @transform_0(%arg0: i32) -> (i32, i32) {
    %c0_i32 = arith.constant 0 : i32
    %c0_i32_0 = arith.constant 0 : i32
    return %arg0, %c0_i32 : i32, i32
  }
  func.func @transform_1(%arg0: i32) -> (i32, i32) {
    %c0_i32 = arith.constant 0 : i32
    %c0_i32_0 = arith.constant 0 : i32
    return %arg0, %c0_i32 : i32, i32
  }
  func.func @transform_2(%arg0: i32) -> (i32, i32) {
    %c0_i32 = arith.constant 0 : i32
    %c0_i32_0 = arith.constant 0 : i32
    %c0_i32_1 = arith.constant 0 : i32
    return %c0_i32, %c0_i32_0 : i32, i32
  }
  func.func @transform_3(%arg0: i32) -> (i32, i32) {
    %c0_i32 = arith.constant 0 : i32
    %c0_i32_0 = arith.constant 0 : i32
    %c0_i32_1 = arith.constant 0 : i32
    return %c0_i32, %c0_i32_0 : i32, i32
  }
  func.func @transform_4(%arg0: i32) -> (i32, i32) {
    %c0_i32 = arith.constant 0 : i32
    %c0_i32_0 = arith.constant 0 : i32
    %c0_i32_1 = arith.constant 0 : i32
    return %c0_i32, %c0_i32_0 : i32, i32
  }
  func.func @transform_5(%arg0: i32) -> (i32, i32) {
    %c0_i32 = arith.constant 0 : i32
    %c0_i32_0 = arith.constant 0 : i32
    return %arg0, %c0_i32 : i32, i32
  }
}

</mosaic_0001>

<bundles_post_ra>
// kernel: _mesh_encoder_forward.3
= control target key start
LH: loop header
LB: loop body
LE: loop exit
PB: predicated region body
PF: predicated region fallthrough
CT: control target
= control target key end

     0   :  { %s541_s3 = inlined_call_operand.vmem [shape: bf16[128,128], index: 3, kind: input, shape index: {}]   ;;  %s542_s2 = inlined_call_operand.vmem [shape: bf16[128,128], index: 2, kind: input, shape index: {}]   ;;  %s543_s1 = inlined_call_operand.vmem [shape: bf16[32,128], index: 1, kind: input, shape index: {}]   ;;  %s544_s0 = inlined_call_operand.vmem [shape: bf16[32,128], index: 0, kind: input, shape index: {}]   ;;  %s545_s4 = inlined_call_operand.vmem [shape: f32[1,128], index: 4, kind: input, shape index: {}]   ;;  %s546_s5 = inlined_call_operand.vmem [shape: bf16[32,128], index: 5, kind: output, shape index: {}]  }
   0x1   :  { %v422_v0 = vld [vmem:[%s541_s3] sm:$0xff]   ;;  %v424_v2 = vld [vmem:[%s541_s3 + $0x8] sm:$0xff]   ;;  %v426_v4 = vld [vmem:[%s541_s3 + $0x10] sm:$0xff]  }
   0x2   :  { %v423_v1 = vld [vmem:[%s542_s2] sm:$0xff]   ;;  %378 = vmatprep.subr.bf16.mxu1 %v422_v0  ;;  %v425_v3 = vld [vmem:[%s542_s2 + $0x8] sm:$0xff]   ;;  %v427_v5 = vld [vmem:[%s542_s2 + $0x10] sm:$0xff]  }
   0x3   :  { %398 = vmatprep.subr.bf16.mxu0 %v423_v1  ;;  %379 = vmatpush3.bf16.msra.mxu1 %v422_v0  ;;  %v428_v6 = vld [vmem:[%s541_s3 + $0x18] sm:$0xff]   ;;  %v430_v8 = vld [vmem:[%s541_s3 + $0x20] sm:$0xff]   ;;  %v432_v10 = vld [vmem:[%s541_s3 + $0x28] sm:$0xff]  }
   0x4   :  { %399 = vmatpush3.bf16.msra.mxu0 %v423_v1  ;;  %380 = vmatprep.subr.bf16.mxu1 %v424_v2  ;;  %v429_v7 = vld [vmem:[%s542_s2 + $0x18] sm:$0xff]   ;;  %v431_v9 = vld [vmem:[%s542_s2 + $0x20] sm:$0xff]   ;;  %v433_v11 = vld [vmem:[%s542_s2 + $0x28] sm:$0xff]  }
   0x5   :  { %400 = vmatprep.subr.bf16.mxu0 %v425_v3  ;;  %v438_v12 = vld [vmem:[%s543_s1] sm:$0xff]   ;;  %v434_v14 = vld [vmem:[%s541_s3 + $0x30] sm:$0xff]   ;;  %v436_v16 = vld [vmem:[%s541_s3 + $0x38] sm:$0xff]  }
   0x6   :  { %v439_v13 = vld [vmem:[%s544_s0] sm:$0xff]   ;;  %394 = vmatprep.mubr.bf16.mxu1 %v438_v12  ;;  %v435_v15 = vld [vmem:[%s542_s2 + $0x30] sm:$0xff]   ;;  %v437_v17 = vld [vmem:[%s542_s2 + $0x38] sm:$0xff]  }
   0x7   :  { %381 = vmatpush3.bf16.msra.mxu1 %v424_v2  ;;  %414 = vmatprep.mubr.bf16.mxu0 %v439_v13  ;;  %v440_v18 = vld [vmem:[%s543_s1 + $0x8] sm:$0xff]   ;;  %v338_v21 = vld [vmem:[%s545_s4] ss:$0 sm:$0xff] }
   0x8   :  { %401 = vmatpush3.bf16.msra.mxu0 %v425_v3  ;;  %382 = vmatprep.subr.bf16.mxu1 %v426_v4  ;;  %v441_v19 = vld [vmem:[%s544_s0 + $0x8] sm:$0xff]  }
   0x9   :  { %402 = vmatprep.subr.bf16.mxu0 %v427_v5 }
   0xb   :  { %383 = vmatpush3.bf16.msra.mxu1 %v426_v4 }
   0xc   :  { %403 = vmatpush3.bf16.msra.mxu0 %v427_v5  ;;  %384 = vmatprep.subr.bf16.mxu1 %v428_v6 }
   0xd   :  { %404 = vmatprep.subr.bf16.mxu0 %v429_v7 }
   0xf   :  { %385 = vmatpush3.bf16.msra.mxu1 %v428_v6 }
  0x10   :  { %405 = vmatpush3.bf16.msra.mxu0 %v429_v7  ;;  %386 = vmatprep.subr.bf16.mxu1 %v430_v8 }
  0x11   :  { %406 = vmatprep.subr.bf16.mxu0 %v431_v9 }
  0x13   :  { %387 = vmatpush3.bf16.msra.mxu1 %v430_v8 }
  0x14   :  { %407 = vmatpush3.bf16.msra.mxu0 %v431_v9  ;;  %388 = vmatprep.subr.bf16.mxu1 %v432_v10 }
  0x15   :  { %408 = vmatprep.subr.bf16.mxu0 %v433_v11 }
  0x17   :  { %389 = vmatpush3.bf16.msra.mxu1 %v432_v10 }
  0x18   :  { %409 = vmatpush3.bf16.msra.mxu0 %v433_v11  ;;  %390 = vmatprep.subr.bf16.mxu1 %v434_v14 }
  0x19   :  { %410 = vmatprep.subr.bf16.mxu0 %v435_v15 }
  0x1b   :  { %391 = vmatpush3.bf16.msra.mxu1 %v434_v14 }
  0x1c   :  { %411 = vmatpush3.bf16.msra.mxu0 %v435_v15  ;;  %392 = vmatprep.subr.bf16.mxu1 %v436_v16 }
  0x1d   :  { %412 = vmatprep.subr.bf16.mxu0 %v437_v17 }
  0x1f   :  { %393 = vmatpush3.bf16.msra.mxu1 %v436_v16 }
  0x20   :  { %413 = vmatpush3.bf16.msra.mxu0 %v437_v17 }
  0x22   :  { %395 = vmatmul.mubr.bf16.vlgmr.msra.gmra.mrb[0].mxu1 %v440_v18 }
  0x23   :  { %415 = vmatmul.mubr.bf16.vlgmr.msra.gmra.mrb[0].mxu0 %v441_v19 }
  0xf5   :  { %v396_v20 = vpop.f32.mrb[0].mxu1 }
  0xf6   :  { %v416_v22 = vpop.f32.mrb[0].mxu0  ;;  %v156_v23 = vpop.f32.mrb[1].mxu1 }
  0xf7   :  { %v274_v24 = vadd.f32 %v416_v22, %v396_v20  ;;  %v265_v25 = vpop.f32.mrb[1].mxu0  ;;  %v397_v26 = vpop.f32.mrb[2].mxu1 }
  0xf8   :  { %v266_v27 = vadd.f32 %v265_v25, %v156_v23  ;;  %v417_v28 = vpop.f32.mrb[2].mxu0  ;;  %v159_v29 = vpop.f32.mrb[3].mxu1 }
  0xf9   :  { %v288_v30 = vadd.f32 %v338_v21, %v274_v24  ;;  %v277_v31 = vadd.f32 %v417_v28, %v397_v26  ;;  %v268_v32 = vpop.f32.mrb[3].mxu0 }
  0xfa   :  { %v286_v33 = vadd.f32 %v338_v21, %v266_v27  ;;  %v269_v34 = vadd.f32 %v268_v32, %v159_v29 }
  0xfb   :  { %v289_v35 = vadd.f32 %v338_v21, %v277_v31  ;;  %v292_v37 = vmax.f32 %v288_v30, 0.0 }
  0xfc   :  { %v287_v36 = vadd.f32 %v338_v21, %v269_v34  ;;  %v290_v39 = vmax.f32 %v286_v33, 0.0 }
  0xfd   :  { %v293_v38 = vmax.f32 %v289_v35, 0.0 }
  0xfe   :  { %v291_v40 = vmax.f32 %v287_v36, 0.0 }
  0xff   :  { %v355_v41 = vpack.c.bf16 %v293_v38, %v292_v37 }
 0x100   :  { %v350_v42 = vpack.c.bf16 %v291_v40, %v290_v39 }
 0x101   :  { %357 = vst [vmem:[%s546_s5 + $0x8] sm:$0xff] %v355_v41  }
 0x102   :  { %351 = vst [vmem:[%s546_s5] sm:$0xff] %v350_v42  }

// kernel: _mesh_encoder_forward.5
= control target key start
LH: loop header
LB: loop body
LE: loop exit
PB: predicated region body
PF: predicated region fallthrough
CT: control target
= control target key end

     0   :  { %s512_s3 = inlined_call_operand.vmem [shape: bf16[128,128], index: 3, kind: input, shape index: {}]   ;;  %s513_s2 = inlined_call_operand.vmem [shape: bf16[128,128], index: 2, kind: input, shape index: {}]   ;;  %s514_s1 = inlined_call_operand.vmem [shape: bf16[32,128], index: 1, kind: input, shape index: {}]   ;;  %s515_s0 = inlined_call_operand.vmem [shape: bf16[32,128], index: 0, kind: input, shape index: {}]   ;;  %s516_s4 = inlined_call_operand.vmem [shape: f32[1,128], index: 4, kind: input, shape index: {}]   ;;  %s517_s5 = inlined_call_operand.vmem [shape: f32[32,128], index: 5, kind: output, shape index: {}]  }
   0x1   :  { %v387_v0 = vld [vmem:[%s512_s3] sm:$0xff]   ;;  %v389_v2 = vld [vmem:[%s512_s3 + $0x8] sm:$0xff]   ;;  %v391_v4 = vld [vmem:[%s512_s3 + $0x10] sm:$0xff]  }
   0x2   :  { %v388_v1 = vld [vmem:[%s513_s2] sm:$0xff]   ;;  %343 = vmatprep.subr.bf16.mxu1 %v387_v0  ;;  %v390_v3 = vld [vmem:[%s513_s2 + $0x8] sm:$0xff]   ;;  %v392_v5 = vld [vmem:[%s513_s2 + $0x10] sm:$0xff]  }
   0x3   :  { %363 = vmatprep.subr.bf16.mxu0 %v388_v1  ;;  %344 = vmatpush3.bf16.msra.mxu1 %v387_v0  ;;  %v393_v6 = vld [vmem:[%s512_s3 + $0x18] sm:$0xff]   ;;  %v395_v8 = vld [vmem:[%s512_s3 + $0x20] sm:$0xff]   ;;  %v397_v10 = vld [vmem:[%s512_s3 + $0x28] sm:$0xff]  }
   0x4   :  { %364 = vmatpush3.bf16.msra.mxu0 %v388_v1  ;;  %345 = vmatprep.subr.bf16.mxu1 %v389_v2  ;;  %v394_v7 = vld [vmem:[%s513_s2 + $0x18] sm:$0xff]   ;;  %v396_v9 = vld [vmem:[%s513_s2 + $0x20] sm:$0xff]   ;;  %v398_v11 = vld [vmem:[%s513_s2 + $0x28] sm:$0xff]  }
   0x5   :  { %365 = vmatprep.subr.bf16.mxu0 %v390_v3  ;;  %v403_v12 = vld [vmem:[%s514_s1] sm:$0xff]   ;;  %v399_v14 = vld [vmem:[%s512_s3 + $0x30] sm:$0xff]   ;;  %v401_v16 = vld [vmem:[%s512_s3 + $0x38] sm:$0xff]  }
   0x6   :  { %v404_v13 = vld [vmem:[%s515_s0] sm:$0xff]   ;;  %359 = vmatprep.mubr.bf16.mxu1 %v403_v12  ;;  %v400_v15 = vld [vmem:[%s513_s2 + $0x30] sm:$0xff]   ;;  %v402_v17 = vld [vmem:[%s513_s2 + $0x38] sm:$0xff]  }
   0x7   :  { %346 = vmatpush3.bf16.msra.mxu1 %v389_v2  ;;  %379 = vmatprep.mubr.bf16.mxu0 %v404_v13  ;;  %v405_v18 = vld [vmem:[%s514_s1 + $0x8] sm:$0xff]   ;;  %v322_v21 = vld [vmem:[%s516_s4] ss:$0 sm:$0xff] }
   0x8   :  { %366 = vmatpush3.bf16.msra.mxu0 %v390_v3  ;;  %347 = vmatprep.subr.bf16.mxu1 %v391_v4  ;;  %v406_v19 = vld [vmem:[%s515_s0 + $0x8] sm:$0xff]  }
   0x9   :  { %367 = vmatprep.subr.bf16.mxu0 %v392_v5 }
   0xb   :  { %348 = vmatpush3.bf16.msra.mxu1 %v391_v4 }
   0xc   :  { %368 = vmatpush3.bf16.msra.mxu0 %v392_v5  ;;  %349 = vmatprep.subr.bf16.mxu1 %v393_v6 }
   0xd   :  { %369 = vmatprep.subr.bf16.mxu0 %v394_v7 }
   0xf   :  { %350 = vmatpush3.bf16.msra.mxu1 %v393_v6 }
  0x10   :  { %370 = vmatpush3.bf16.msra.mxu0 %v394_v7  ;;  %351 = vmatprep.subr.bf16.mxu1 %v395_v8 }
  0x11   :  { %371 = vmatprep.subr.bf16.mxu0 %v396_v9 }
  0x13   :  { %352 = vmatpush3.bf16.msra.mxu1 %v395_v8 }
  0x14   :  { %372 = vmatpush3.bf16.msra.mxu0 %v396_v9  ;;  %353 = vmatprep.subr.bf16.mxu1 %v397_v10 }
  0x15   :  { %373 = vmatprep.subr.bf16.mxu0 %v398_v11 }
  0x17   :  { %354 = vmatpush3.bf16.msra.mxu1 %v397_v10 }
  0x18   :  { %374 = vmatpush3.bf16.msra.mxu0 %v398_v11  ;;  %355 = vmatprep.subr.bf16.mxu1 %v399_v14 }
  0x19   :  { %375 = vmatprep.subr.bf16.mxu0 %v400_v15 }
  0x1b   :  { %356 = vmatpush3.bf16.msra.mxu1 %v399_v14 }
  0x1c   :  { %376 = vmatpush3.bf16.msra.mxu0 %v400_v15  ;;  %357 = vmatprep.subr.bf16.mxu1 %v401_v16 }
  0x1d   :  { %377 = vmatprep.subr.bf16.mxu0 %v402_v17 }
  0x1f   :  { %358 = vmatpush3.bf16.msra.mxu1 %v401_v16 }
  0x20   :  { %378 = vmatpush3.bf16.msra.mxu0 %v402_v17 }
  0x22   :  { %360 = vmatmul.mubr.bf16.vlgmr.msra.gmra.mrb[0].mxu1 %v405_v18 }
  0x23   :  { %380 = vmatmul.mubr.bf16.vlgmr.msra.gmra.mrb[0].mxu0 %v406_v19 }
  0xf5   :  { %v361_v20 = vpop.f32.mrb[0].mxu1 }
  0xf6   :  { %v381_v22 = vpop.f32.mrb[0].mxu0  ;;  %v156_v23 = vpop.f32.mrb[1].mxu1 }
  0xf7   :  { %v274_v24 = vadd.f32 %v381_v22, %v361_v20  ;;  %v265_v25 = vpop.f32.mrb[1].mxu0  ;;  %v362_v26 = vpop.f32.mrb[2].mxu1 }
  0xf8   :  { %v266_v27 = vadd.f32 %v265_v25, %v156_v23  ;;  %v382_v28 = vpop.f32.mrb[2].mxu0  ;;  %v159_v29 = vpop.f32.mrb[3].mxu1 }
  0xf9   :  { %v288_v30 = vadd.f32 %v322_v21, %v274_v24  ;;  %v277_v31 = vadd.f32 %v382_v28, %v362_v26  ;;  %v268_v32 = vpop.f32.mrb[3].mxu0 }
  0xfa   :  { %v286_v33 = vadd.f32 %v322_v21, %v266_v27  ;;  %v269_v34 = vadd.f32 %v268_v32, %v159_v29 }
  0xfb   :  { %v292_v35 = vmax.f32 %v288_v30, 0.0  ;;  %v289_v36 = vadd.f32 %v322_v21, %v277_v31 }
  0xfc   :  { %v290_v37 = vmax.f32 %v286_v33, 0.0  ;;  %v287_v38 = vadd.f32 %v322_v21, %v269_v34 }
  0xfd   :  { %296 = vst [vmem:[%s517_s5 + $0x10] sm:$0xff] %v292_v35  ;;  %v293_v39 = vmax.f32 %v289_v36, 0.0 }
  0xfe   :  { %294 = vst [vmem:[%s517_s5] sm:$0xff] %v290_v37  ;;  %v291_v40 = vmax.f32 %v287_v38, 0.0 }
  0xff   :  { %297 = vst [vmem:[%s517_s5 + $0x18] sm:$0xff] %v293_v39 }
 0x100   :  { %295 = vst [vmem:[%s517_s5 + $0x8] sm:$0xff] %v291_v40 }

</bundles_post_ra>
